<compile_context>
chip_gen: v7x
topology: tpu7x:2x2x1
jax: 0.10.0
libtpu: 0.0.40
codegen_flags: <defaults>
</compile_context>

<pallas_src>
import functools

import jax
import jax.numpy as jnp
from jax.experimental import pallas as pl
from jax.experimental.pallas import tpu as pltpu


# --------------------------------------------------------------------------- kernel


def _inv_pixel_shuffle_kernel(x_ref, s_ref, o_ref, *, ratio: int):
    """One grid step: de-interleave `tc` channels x `hb` output rows.

    x_ref: (tc, hb, r*W)    rows are output rows i; lanes are (ry, original column).
    s_ref: (r, W, Wr)       0/1 selection: S[rx, jj, k] = (jj == k*r + rx).
    o_ref: (tc*r*r, hb, Wr) output channels (c, ry, rx) stacked on dim 0.
    """
    r = ratio
    tc = x_ref.shape[0]
    w = x_ref.shape[2] // r                       # original image width W

    def per_channel(c, carry):
        xc = x_ref[c]                             # (hb, r*W)
        for ry in range(r):                       # r is tiny -> static unroll
            xr = xc[:, ry * w:(ry + 1) * w]       # (hb, W): row-phase ry, all columns
            for rx in range(r):
                # MXU 0/1 selection: y[i, k] = xr[i, k*r + rx]; exact for finite floats,
                # f32 accumulate is exact for bf16/f16 too (single nonzero term per sum).
                # TODO(synk): 0*Inf / 0*NaN in the selection matmul can leak non-finites
                # across a row; matching PyTorch bit-exactly for non-finite inputs would
                # need a gather-based lane de-interleave instead of the MXU trick.
                y = jnp.dot(xr, s_ref[rx], preferred_element_type=jnp.float32)
                o_ref[c * (r * r) + ry * r + rx] = y.astype(o_ref.dtype)
        return carry

    if tc <= 4:
        # Short fixed trip count: full static unroll (LLO scheduler visibility).
        for c in range(tc):
            per_channel(c, 0)
    else:
        # Bounded live ranges for large channel blocks.
        jax.lax.fori_loop(0, tc, per_channel, 0)


# --------------------------------------------------------------- tiling / VMEM sizing


def _round_up(x, m):
    return ((x + m - 1) // m) * m


def _sublane(dtype):
    # sublane granularity per dtype: f32 -> 8, bf16/f16 -> 16, int8/fp8 -> 32
    return max(8, 32 // jnp.dtype(dtype).itemsize)


def _padded_bytes(shape, dtype):
    """VMEM footprint of a block: last dim padded to 128 lanes, second-to-last to the
    dtype's sublane granularity, leading dims multiply (Mosaic tiles the last two dims)."""
    isz = jnp.dtype(dtype).itemsize
    shape = tuple(int(d) for d in shape)
    if len(shape) == 1:
        shape = (1,) + shape
    lead = 1
    for d in shape[:-2]:
        lead *= d
    return lead * _round_up(shape[-2], _sublane(dtype)) * _round_up(shape[-1], 128) * isz


def _vmem_budget():
    """(working-set budget, vmem_limit_bytes), generation aware."""
    try:
        cap = int(pltpu.get_tpu_info().vmem_capacity_bytes)
    except Exception:  # no TPU info available -> assume the smallest (v7x, 64 MiB)
        cap = 64 * 1024 * 1024
    if cap >= 100 * 1024 * 1024:          # v5e / v6e: 128 MiB physical VMEM
        return 48 * 1024 * 1024, 96 * 1024 * 1024
    return 14 * 1024 * 1024, 32 * 1024 * 1024   # v7x: 64 MiB physical VMEM


def _choose_tiling(B, C, Hr, W, Wr, r, dtype, budget,
                   tc_force=None, hb_force=None, target_steps=8):
    """Pick (channels per step tc, output rows per step hb)."""
    rW = r * W
    sub = _sublane(dtype)

    def footprint(tc, hb):
        in_blk = _padded_bytes((tc, hb, rW), dtype)
        out_blk = _padded_bytes((tc * r * r, hb, Wr), dtype)
        s_blk = _padded_bytes((r, W, Wr), dtype)
        live = (_padded_bytes((hb, rW), dtype) + _padded_bytes((hb, W), dtype)
                + _padded_bytes((hb, Wr), jnp.float32))
        # in/out double-buffered by the pipeline; S conservatively counted twice as well.
        return 2 * (in_blk + out_blk) + 2 * s_blk + live

    tcs = [tc_force] if tc_force else [t for t in range(1, C + 1) if C % t == 0]
    hbs = [hb_force] if hb_force else [h for h in range(1, Hr + 1)
                                       if Hr % h == 0 and (h == Hr or h % sub == 0)]

    feasible = [(t, h) for t in tcs for h in hbs if footprint(t, h) <= budget]
    if not feasible:
        # Even the smallest block exceeds the budget -> best effort (still correct).
        feasible = [(min(tcs), min(hbs))]

    def steps(t, h):
        return B * (C // t) * (Hr // h)

    max_steps = max(steps(t, h) for t, h in feasible)
    target = min(target_steps, max_steps)     # keep both v7x TensorCores busy if possible
    good = [(t, h) for t, h in feasible if steps(t, h) >= target]
    # Biggest per-step payload (amortize ~0.35us/step), tie-break on longer row runs.
    return max(good, key=lambda p: (p[0] * p[1], p[1]))


# ------------------------------------------------------------------------- wrapper


def _reference_inv_pixel_shuffle(x: jax.Array, ratio: int = 2) -> jax.Array:
    b, c, h, w = x.shape
    t = x.reshape(b, c, h // ratio, ratio, w // ratio, ratio)
    t = jnp.transpose(t, (0, 1, 3, 5, 2, 4))
    return t.reshape(b, c * ratio * ratio, h // ratio, w // ratio)


def inv_pixel_shuffle(x: jax.Array, ratio: int = 2,
                      channels_per_step=None, rows_per_step=None) -> jax.Array:
    B, C, H, W = x.shape
    assert H % ratio == 0 and W % ratio == 0, 'x, y, ratio : {}, {}, {}'.format(W, H, ratio)
    r = int(ratio)
    if r == 1:
        return x
    Hr, Wr = H // r, W // r

    # The MXU 0/1-selection path is exact only for float inputs; integer / exotic dtypes
    # fall back to the (memory-bound, XLA-handled) reference reshuffle.
    if jnp.dtype(x.dtype) not in (jnp.dtype(jnp.float32), jnp.dtype(jnp.bfloat16),
                                  jnp.dtype(jnp.float16)):
        return _reference_inv_pixel_shuffle(x, r)

    budget, vmem_limit = _vmem_budget()
    tc, hb = _choose_tiling(B, C, Hr, W, Wr, r, x.dtype, budget,
                            tc_force=channels_per_step, hb_force=rows_per_step)
    assert C % tc == 0, (C, tc)
    assert Hr % hb == 0, (Hr, hb)
    G, HS = C // tc, Hr // hb

    # 0/1 selection matrices, one (W, Wr) slice per rx:  S[rx, jj, k] = (jj == k*r + rx).
    jj = jnp.arange(W, dtype=jnp.int32)[None, :, None]
    kk = jnp.arange(Wr, dtype=jnp.int32)[None, None, :]
    rxs = jnp.arange(r, dtype=jnp.int32)[:, None, None]
    S = (jj == kk * r + rxs).astype(x.dtype)                          # (r, W, Wr)

    # Free (row-major) reshape: split H into (Hr, r) and fold the r row-phases into lanes.
    x_r = x.reshape(B, G, tc, Hr, r * W)

    kernel = functools.partial(_inv_pixel_shuffle_kernel, ratio=r)
    isz = jnp.dtype(x.dtype).itemsize

    out = pl.pallas_call(
        kernel,
        out_shape=jax.ShapeDtypeStruct((B, G, tc * r * r, Hr, Wr), x.dtype),
        grid_spec=pltpu.PrefetchScalarGridSpec(
            num_scalar_prefetch=0,
            grid=(B, G, HS),
            in_specs=[
                pl.BlockSpec((None, None, tc, hb, r * W),
                             lambda b, g, h: (b, g, 0, h, 0)),
                # Constant block index -> the selection matrix stays resident in VMEM.
                pl.BlockSpec((r, W, Wr), lambda b, g, h: (0, 0, 0)),
            ],
            out_specs=pl.BlockSpec((None, None, tc * r * r, hb, Wr),
                                   lambda b, g, h: (b, g, 0, h, 0)),
        ),
        compiler_params=pltpu.CompilerParams(
            dimension_semantics=("parallel", "parallel", "parallel"),
            vmem_limit_bytes=vmem_limit,
        ),
        cost_estimate=pl.CostEstimate(
            flops=0,  # pure data movement -> let XLA treat it as memory-bound
            transcendentals=0,
            bytes_accessed=2 * B * C * H * W * isz + r * W * Wr * isz,
        ),
    )(x_r, S)

    # Free reshape back to the PyTorch output layout (adjacent-dim merges only).
    return out.reshape(B, C * r * r, Hr, Wr)


# --------------------------------------------------------------------------- tests


if __name__ == "__main__":
    key = jax.random.PRNGKey(0)

    # Test 1: module default (ratio=2) at a small NCHW shape; automatic tiling.
    B, C, H, W = 2, 4, 16, 16
    ratio = 2
    x = jax.random.normal(key, (B, C, H, W), dtype=jnp.float32)
    out = jax.block_until_ready(inv_pixel_shuffle(x, ratio=ratio))
    ref = _reference_inv_pixel_shuffle(x, ratio=ratio)
    assert out.shape == (B, C * ratio * ratio, H // ratio, W // ratio), out.shape
    assert out.dtype == x.dtype, out.dtype
    assert bool(jnp.array_equal(out, ref)), "mismatch vs reference (f32, auto tiling)"

    # Test 2: bf16 + forced channel block -> multi-step channel grid axis.
    x2 = jax.random.normal(jax.random.PRNGKey(0), (1, 8, 32, 32), dtype=jnp.bfloat16)
    out2 = jax.block_until_ready(inv_pixel_shuffle(x2, ratio=2, channels_per_step=2))
    ref2 = _reference_inv_pixel_shuffle(x2, ratio=2)
    assert out2.dtype == x2.dtype, out2.dtype
    assert bool(jnp.array_equal(out2, ref2)), "mismatch vs reference (bf16)"

    # Test 3: forced large channel block (dynamic fori_loop path) + row (H) splitting.
    x3 = jax.random.normal(jax.random.PRNGKey(0), (1, 8, 32, 16), dtype=jnp.float32)
    out3 = jax.block_until_ready(
        inv_pixel_shuffle(x3, ratio=2, channels_per_step=8, rows_per_step=8))
    ref3 = _reference_inv_pixel_shuffle(x3, ratio=2)
    assert bool(jnp.array_equal(out3, ref3)), "mismatch vs reference (fori_loop + H-split)"

    print("KERNEL_OK")
</pallas_src>

<mosaic_0001>
module attributes {stable_mosaic.version = 11 : i64} {
  func.func @_inv_pixel_shuffle_kernel(%arg0: i32, %arg1: i32, %arg2: i32, %arg3: memref<1x1x1x8x32xf32, #tpu.memory_space<vmem>>, %arg4: memref<2x16x8xf32, #tpu.memory_space<vmem>>, %arg5: memref<1x1x4x8x8xf32, #tpu.memory_space<vmem>>) attributes {dimension_semantics = [#tpu.dimension_semantics<parallel>, #tpu.dimension_semantics<parallel>, #tpu.dimension_semantics<parallel>], iteration_bounds = array<i64: 2, 4, 1>, scalar_prefetch = 0 : i64, scratch_operands = 0 : i64, tpu.core_type = #tpu.core_type<tc>, window_params = [{transform_indices = @transform_0, window_bounds = array<i64: 1, 1, 1, 8, 32>}, {pipeline_mode = #tpu.pipeline_mode<synchronous>, transform_indices = @transform_1, window_bounds = array<i64: 2, 16, 8>}, {transform_indices = @transform_2, window_bounds = array<i64: 1, 1, 4, 8, 8>}]} {
    %c0 = arith.constant 0 : index
    %c0_0 = arith.constant 0 : index
    %c0_1 = arith.constant 0 : index
    %c0_2 = arith.constant 0 : index
    %c0_3 = arith.constant 0 : index
    %0 = vector.load %arg3[%c0, %c0_0, %c0_1, %c0_2, %c0_3] : memref<1x1x1x8x32xf32, #tpu.memory_space<vmem>>, vector<1x1x1x8x32xf32>
    %1 = vector.shape_cast %0 : vector<1x1x1x8x32xf32> to vector<8x32xf32>
    %2 = vector.extract_strided_slice %1 {offsets = [0, 0], sizes = [8, 16], strides = [1, 1]} : vector<8x32xf32> to vector<8x16xf32>
    %c0_4 = arith.constant 0 : index
    %c0_5 = arith.constant 0 : index
    %c0_6 = arith.constant 0 : index
    %3 = vector.load %arg4[%c0_4, %c0_5, %c0_6] : memref<2x16x8xf32, #tpu.memory_space<vmem>>, vector<1x16x8xf32>
    %4 = vector.shape_cast %3 : vector<1x16x8xf32> to vector<16x8xf32>
    %cst = arith.constant dense<0.000000e+00> : vector<8x8xf32>
    %5 = tpu.matmul %2, %4, %cst {dimension_numbers = #tpu.dot_dimension_numbers<[1], [0], [0], [1], [0, 0, 1, 1], [], []>} : vector<8x16xf32>, vector<16x8xf32>, vector<8x8xf32> -> vector<8x8xf32>
    %c0_7 = arith.constant 0 : index
    %c0_8 = arith.constant 0 : index
    %c0_9 = arith.constant 0 : index
    %c0_10 = arith.constant 0 : index
    %c0_11 = arith.constant 0 : index
    %6 = vector.load %arg5[%c0_7, %c0_8, %c0_9, %c0_10, %c0_11] : memref<1x1x4x8x8xf32, #tpu.memory_space<vmem>>, vector<1x1x1x8x8xf32>
    %7 = vector.shape_cast %6 : vector<1x1x1x8x8xf32> to vector<8x8xf32>
    %8 = vector.shape_cast %5 : vector<8x8xf32> to vector<1x1x1x8x8xf32>
    tpu.vector_store %arg5[%c0_7, %c0_8, %c0_9, %c0_10, %c0_11], %8 {strides = array<i32>} : memref<1x1x4x8x8xf32, #tpu.memory_space<vmem>>, vector<1x1x1x8x8xf32>,
    %c1 = arith.constant 1 : index
    %c0_12 = arith.constant 0 : index
    %c0_13 = arith.constant 0 : index
    %9 = vector.load %arg4[%c1, %c0_12, %c0_13] : memref<2x16x8xf32, #tpu.memory_space<vmem>>, vector<1x16x8xf32>
    %10 = vector.shape_cast %9 : vector<1x16x8xf32> to vector<16x8xf32>
    %cst_14 = arith.constant dense<0.000000e+00> : vector<8x8xf32>
    %11 = tpu.matmul %2, %10, %cst_14 {dimension_numbers = #tpu.dot_dimension_numbers<[1], [0], [0], [1], [0, 0, 1, 1], [], []>} : vector<8x16xf32>, vector<16x8xf32>, vector<8x8xf32> -> vector<8x8xf32>
    %c0_15 = arith.constant 0 : index
    %c0_16 = arith.constant 0 : index
    %c1_17 = arith.constant 1 : index
    %c0_18 = arith.constant 0 : index
    %c0_19 = arith.constant 0 : index
    %12 = vector.load %arg5[%c0_15, %c0_16, %c1_17, %c0_18, %c0_19] : memref<1x1x4x8x8xf32, #tpu.memory_space<vmem>>, vector<1x1x1x8x8xf32>
    %13 = vector.shape_cast %12 : vector<1x1x1x8x8xf32> to vector<8x8xf32>
    %14 = vector.shape_cast %11 : vector<8x8xf32> to vector<1x1x1x8x8xf32>
    tpu.vector_store %arg5[%c0_15, %c0_16, %c1_17, %c0_18, %c0_19], %14 {strides = array<i32>} : memref<1x1x4x8x8xf32, #tpu.memory_space<vmem>>, vector<1x1x1x8x8xf32>,
    %15 = vector.extract_strided_slice %1 {offsets = [0, 16], sizes = [8, 16], strides = [1, 1]} : vector<8x32xf32> to vector<8x16xf32>
    %c0_20 = arith.constant 0 : index
    %c0_21 = arith.constant 0 : index
    %c0_22 = arith.constant 0 : index
    %16 = vector.load %arg4[%c0_20, %c0_21, %c0_22] : memref<2x16x8xf32, #tpu.memory_space<vmem>>, vector<1x16x8xf32>
    %17 = vector.shape_cast %16 : vector<1x16x8xf32> to vector<16x8xf32>
    %cst_23 = arith.constant dense<0.000000e+00> : vector<8x8xf32>
    %18 = tpu.matmul %15, %17, %cst_23 {dimension_numbers = #tpu.dot_dimension_numbers<[1], [0], [0], [1], [0, 0, 1, 1], [], []>} : vector<8x16xf32>, vector<16x8xf32>, vector<8x8xf32> -> vector<8x8xf32>
    %c0_24 = arith.constant 0 : index
    %c0_25 = arith.constant 0 : index
    %c2 = arith.constant 2 : index
    %c0_26 = arith.constant 0 : index
    %c0_27 = arith.constant 0 : index
    %19 = vector.load %arg5[%c0_24, %c0_25, %c2, %c0_26, %c0_27] : memref<1x1x4x8x8xf32, #tpu.memory_space<vmem>>, vector<1x1x1x8x8xf32>
    %20 = vector.shape_cast %19 : vector<1x1x1x8x8xf32> to vector<8x8xf32>
    %21 = vector.shape_cast %18 : vector<8x8xf32> to vector<1x1x1x8x8xf32>
    tpu.vector_store %arg5[%c0_24, %c0_25, %c2, %c0_26, %c0_27], %21 {strides = array<i32>} : memref<1x1x4x8x8xf32, #tpu.memory_space<vmem>>, vector<1x1x1x8x8xf32>,
    %c1_28 = arith.constant 1 : index
    %c0_29 = arith.constant 0 : index
    %c0_30 = arith.constant 0 : index
    %22 = vector.load %arg4[%c1_28, %c0_29, %c0_30] : memref<2x16x8xf32, #tpu.memory_space<vmem>>, vector<1x16x8xf32>
    %23 = vector.shape_cast %22 : vector<1x16x8xf32> to vector<16x8xf32>
    %cst_31 = arith.constant dense<0.000000e+00> : vector<8x8xf32>
    %24 = tpu.matmul %15, %23, %cst_31 {dimension_numbers = #tpu.dot_dimension_numbers<[1], [0], [0], [1], [0, 0, 1, 1], [], []>} : vector<8x16xf32>, vector<16x8xf32>, vector<8x8xf32> -> vector<8x8xf32>
    %c0_32 = arith.constant 0 : index
    %c0_33 = arith.constant 0 : index
    %c3 = arith.constant 3 : index
    %c0_34 = arith.constant 0 : index
    %c0_35 = arith.constant 0 : index
    %25 = vector.load %arg5[%c0_32, %c0_33, %c3, %c0_34, %c0_35] : memref<1x1x4x8x8xf32, #tpu.memory_space<vmem>>, vector<1x1x1x8x8xf32>
    %26 = vector.shape_cast %25 : vector<1x1x1x8x8xf32> to vector<8x8xf32>
    %27 = vector.shape_cast %24 : vector<8x8xf32> to vector<1x1x1x8x8xf32>
    tpu.vector_store %arg5[%c0_32, %c0_33, %c3, %c0_34, %c0_35], %27 {strides = array<i32>} : memref<1x1x4x8x8xf32, #tpu.memory_space<vmem>>, vector<1x1x1x8x8xf32>,
    return
  }
  func.func @transform_0(%arg0: i32, %arg1: i32, %arg2: i32) -> (i32, i32, i32, i32, i32) {
    %c0_i32 = arith.constant 0 : i32
    %c0_i32_0 = arith.constant 0 : i32
    %c0_i32_1 = arith.constant 0 : i32
    return %arg0, %arg1, %c0_i32, %arg2, %c0_i32_0 : i32, i32, i32, i32, i32
  }
  func.func @transform_1(%arg0: i32, %arg1: i32, %arg2: i32) -> (i32, i32, i32) {
    %c0_i32 = arith.constant 0 : i32
    %c0_i32_0 = arith.constant 0 : i32
    %c0_i32_1 = arith.constant 0 : i32
    %c0_i32_2 = arith.constant 0 : i32
    return %c0_i32, %c0_i32_0, %c0_i32_1 : i32, i32, i32
  }
  func.func @transform_2(%arg0: i32, %arg1: i32, %arg2: i32) -> (i32, i32, i32, i32, i32) {
    %c0_i32 = arith.constant 0 : i32
    %c0_i32_0 = arith.constant 0 : i32
    %c0_i32_1 = arith.constant 0 : i32
    return %arg0, %arg1, %c0_i32, %arg2, %c0_i32_0 : i32, i32, i32, i32, i32
  }
}

</mosaic_0001>

<bundles_post_ra>
// kernel: tpu_custom_call.1
= control target key start
LH: loop header
LB: loop body
LE: loop exit
PB: predicated region body
PF: predicated region fallthrough
CT: control target
= control target key end

     0   :  { %7 = vsyncpa [#allocation3], 0  ;;  %s1139_s0 = inlined_call_operand.hbm [shape: f32[2,4,1,8,32], index: 0, kind: input, shape index: {}]   ;;  %s1140_s1 = inlined_call_operand.vmem [shape: f32[2,16,8], index: 1, kind: input, shape index: {}]   ;;  %s1141_s2 = inlined_call_operand.hbm [shape: f32[2,4,4,8,8], index: 2, kind: output, shape index: {}]  }
   0x1   :  { %9 = vsyncpa [#allocation3 + $0x1], 0 }
   0x2   :  { %10 = vsyncpa [#allocation4], 0 }
   0x3   :  { %12 = vsyncpa [#allocation4 + $0x1], 0  ;;  %s922_s9 = smov 0   ;;  %s924_s10 = smov 0  }
   0x4   :  { %s926_s11 = smov 0   ;;  %s928_s12 = smov 0  }
   0x5   :  { %s930_s13 = smov 0   ;;  %s932_s14 = smov 0  }
   0x6   :  { %s934_s15 = smov 0   ;;  %s936_s16 = smov 0  }
   0x7 LB: > { %s606_s17 = sadd.s32 4294967295, %s897_s16   ;;  %s607_s18 = sadd.s32 4294967294, %s897_s16   ;;  %s897_s16 = sphi %s936_s16, %s18_s16   ;;  %s893_s15 = sphi %s934_s15, %s1158_s15   ;;  %s889_s14 = sphi %s932_s14, %s1157_s14   ;;  %s885_s13 = sphi %s930_s13, %s1156_s13   ;;  %s881_s12 = sphi %s928_s12, %s1155_s12   ;;  %s877_s11 = sphi %s926_s11, %s1154_s11   ;;  %s873_s10 = sphi %s924_s10, %s1153_s10   ;;  %s869_s9 = sphi %s922_s9, %s1152_s9  }
   0x8   : > { %s33_s19 = sadd.s32 1, %s889_s14  ;;  %s37_s20 = sadd.s32 1, %s893_s15 }
   0x9   : > { %p35_p0 = scmp.ge.s32.totalorder %s33_s19, 4  ;;  %s48_s21 = sadd.s32 1, %s877_s11 }
   0xa   : > { %p55_p1 = scmp.ne.s32.totalorder %s877_s11, %s873_s10  ;;  %p56_p2 = scmp.eq.s32.totalorder %s897_s16, 0 }
   0xb   : > { %s1160_s19 = smov (%p35_p0, %s33_s19), 0  ;;  %s1162_s20 = smov (!%p35_p0, %s37_s20), %s893_s15 }
   0xc   : > { %s42_s22 = ssub.s32 %s889_s14, %s1160_s19  ;;  %p975_p3 = por %p56_p2, %p55_p1 }
   0xd   : > { %p39_p4 = scmp.ge.s32.totalorder %s1162_s20, 2  ;;  %p61_p5 = scmp.ne.s32.totalorder %s873_s10, %s869_s9 }
   0xe   : > { %p62_p6 = scmp.eq.s32.totalorder %s606_s17, 0  ;;  %p110_p7 = scmp.eq.s32.totalorder %s606_s17, 7 }
   0xf   : > { %s1164_s20 = smov (%p39_p4, %s1162_s20), 0  ;;  %p116_p10 = scmp.eq.s32.totalorder %s607_s18, 7 }
  0x10   : > { %p983_p8 = por %p62_p6, %p61_p5  ;;  %p987_p9 = por %p110_p7, %p55_p1 }
  0x11   : > { %s41_s26 = ssub.s32 %s893_s15, %s1164_s20  ;;  %p993_p12 = por %p116_p10, %p61_p5 }
  0x12   : > { %s1145_s25 = scalar_select %p987_p9, 1, 0 }
  0x13   : > { %s43_s27 = sor.u32 %s42_s22, %s41_s26  ;;  %p697_p13 = scmp.lt.s32.totalorder %s897_s16, 8 }
  0x14   : > { %p46_p11 = scmp.eq.s32.totalorder %s43_s27, 0  ;;  %s139_s29 = sand.u32 1, %s877_s11  }
  0x15   : > { %s1146_s28 = scalar_select %p993_p12, 1, 0 }
  0x16   : > { %s1000_s30 = scalar_select %p46_p11, %s877_s11, %s48_s21  }
  0x17   : > { %s610_s3 = sshll.u32 %s139_s29, 3  ;;  %s611_s4 = sshll.u32 %s893_s15, 2 }
  0x18   : > { %s149_s5 = sadd.s32 %s889_s14, %s611_s4  ;;  %s143_s6 = scalar_lea.vmem [#allocation2], %s610_s3 }
  0x19   : > { %s153_s7 = sshll.u32 %s143_s6, 4  ;;  %s612_s8 = sshll.u32 %s149_s5, 7  ;;  %s1004_s7 = int_to_ptr.vmem [resolvable:$true] %s153_s7 }
  0x1a   : > { %s1009_s22 = scalar_lea.hbm %s1139_s0, %s612_s8  ;;  %p1013_p0 = pnand %p697_p13, %p975_p3 }
  0x1b   : > { %s140_s26 = scalar_lea.sflag [#allocation3], %s139_s29  ;;  %s769_s27 = scalar_lea.hbm %s1009_s22, 128 }
  0x1c   : > { %p770_p4 = scmp.ne.s32.totalorder %s1009_s22, %s769_s27  ;;  %p771_p5 = pneg %p1013_p0 }
  0x1d   : > { %s774_s4 = scalar_lea.hbm %s1139_s0, 1024  ;;  %p775_p3 = scmp.lt.u32.totalorder %s1009_s22, %s1139_s0 }
  0x1e   : > { %p772_p6 = pnand %p771_p5, %p770_p4  ;;  %p776_p10 = scmp.lt.u32.totalorder %s774_s4, %s769_s27 }
  0x1f   : > { %p778_p13 = scmp.lt.u32.totalorder %s769_s27, %s1009_s22 }
  0x20   : > { %p773_p7 = pneg %p772_p6  ;;  %p777_p11 = por %p776_p10, %p775_p3 }
  0x22   : > { %p779_p1 = por %p778_p13, %p777_p11 }
  0x24   : > { %p780_p2 = pnand %p779_p1, %p773_p7 }
  0x26   : > { %783 = shalt.err (!%p780_p2)
}
  0x27   : > { %s784_s29 = scalar_lea.vmem %s1004_s7, 128  ;;  %s899_s8 = smov [#allocation2]  }
  0x28   : > { %p785_p4 = scmp.ne.s32.totalorder %s1004_s7, %s784_s29  ;;  %s789_s17 = sshll.u32 %s899_s8, 4  ;;  %s790_s17 = int_to_ptr.vmem [resolvable:$false] %s789_s17 }
  0x29   : > { %s791_s18 = scalar_lea.vmem %s790_s17, 256  ;;  %p792_p9 = scmp.lt.s32.totalorder %s1004_s7, %s790_s17 }
  0x2a   : > { %p787_p6 = pnand %p785_p4, %p771_p5  ;;  %p793_p3 = scmp.lt.s32.totalorder %s791_s18, %s784_s29 }
  0x2c   : > { %p788_p12 = pneg %p787_p6  ;;  %p794_p10 = por %p793_p3, %p792_p9 }
  0x2e   : > { %p795_p11 = pnand %p794_p10, %p788_p12 }
  0x30   : > { %798 = shalt.err (!%p795_p11)
}
  0x31   : > { %692 = dma.hbm_to_vmem [thread:$0]  (!%p1013_p0), %s1009_s22, 128, %s1004_s7, %s140_s26  }
  0x32   : > { %p1148_p1 = scmp.lt.s32.totalorder %s897_s16, 9  ;;  %p1149_p2 = scmp.ge.s32.totalorder %s897_s16, 1 }
  0x34   : > { %p159_p5 = pnand %p1149_p2, %p1148_p1 }
  0x35   : > { %s1049_s27 = sand.u32 (!%p159_p5), 1, %s873_s10  }
  0x36   : > { %162 = sbr.rel (%p159_p5) target bundleno = 407 (0x197), region = 28  ;;  %s614_s23 = sshll.u32 (!%p159_p5), %s1049_s27, 3 }
  0x37   : > { %s165_s3 = scalar_lea.sflag (!%p159_p5), [#allocation3], %s1049_s27  ;;  %s168_s4 = scalar_lea.vmem (!%p159_p5), [#allocation2], %s614_s23 }
  0x3d   : > { %860 = dma.done.wait (%p983_p8), %s165_s3, 128  }
  0x3e   : > { %862 = vsyncadd (%p983_p8), %s165_s3, 4294967168  ;;  %v900_v0 = vmov 0.0|0.0   ;;  %vm901_vm0 = vmmov 0   ;;  %v902_v1 = vmov 0.0   ;;  %v189_v2 = vld [vmem:[%s168_s4] sm:$0xff]  ;;  %s903_s24 = smov 112  }
  0x3f   : > { %673 = vmatprep.subr.bf16.mxu0 %v900_v0  ;;  %676 = vmatprep.subr.bf16.mxu1 %v900_v0  ;;  %v190_v3 = vld [vmem:[%s1140_s1] sm:$0xff]  ;;  %v191_v4 = vld [vmem:[%s1140_s1 + $0x8] sm:$0xff]  ;;  %v617_v6 = vld [vmem:[%s1140_s1 + $0x10] sm:$0xff]  ;;  %vm192_vm1 = vcmask 130048   ;;  %s615_s17 = sshll.u32 %s1049_s27, 5  ;;  %vm266_vm2 = vcmask 64512  }
  0x40   : > { %649 = vmatprep.mubr.msk.f32.mxu0 %vm901_vm0, %v902_v1  ;;  %656 = vmatprep.mubr.msk.f32.mxu1 %vm901_vm0, %v902_v1  ;;  %v674_v5 = vpack.c.bf16 %v191_v4, %v190_v3  ;;  %v618_v7 = vld [vmem:[%s1140_s1 + $0x18] sm:$0xff]  ;;  %s188_s18 = scalar_lea.vmem [#allocation5], %s615_s17  ;;  %s628_s23 = sshll.u32 %s881_s12, 2 }
  0x41   : > { %345 = vrot.lane.b32.xlu0 %v189_v2, %s903_s24  ;;  %v677_v8 = vpack.c.bf16 %v618_v7, %v617_v6  ;;  %s629_s3 = sshll.u32 %s885_s13, 4  ;;  %s512_s7 = sshll.u32 %s188_s18, 4  ;;  %s1078_s7 = int_to_ptr.vmem [resolvable:$true] %s512_s7 }
  0x42   : > { %675 = vmatpush3.bf16.msra.mxu0 %v674_v5  ;;  %s509_s4 = sadd.s32 %s629_s3, %s628_s23  ;;  %s496_s12 = scalar_lea.sflag [#allocation4], %s1049_s27 }
  0x43   : > { %678 = vmatpush3.bf16.msra.mxu1 %v677_v8  ;;  %679 = vmatprep.subr.bf16.mxu0 %v900_v0  ;;  %s630_s22 = sshll.u32 %s509_s4, 7  ;;  %s799_s13 = scalar_lea.vmem %s1078_s7, 512 }
  0x44   : > { %682 = vmatprep.subr.bf16.mxu1 %v900_v0  ;;  %s1083_s24 = scalar_lea.hbm %s1141_s2, %s630_s22  ;;  %p800_p8 = scmp.ne.s32.totalorder %s1078_s7, %s799_s13 }
  0x45   : > { %650 = vmatmul.mubr.msk.f32.vlgmr.msra.gmra.mrb[0].mxu0 %vm192_vm1, %v189_v2  ;;  %p1150_p9 = scmp.ne.s32.totalorder %s1145_s25, 0  ;;  %s904_s5 = smov [#allocation5]  }
  0x46   : > { %657 = vmatmul.mubr.msk.f32.vlgmr.msra.gmra.mrb[0].mxu1 %vm192_vm1, %v189_v2  ;;  %681 = vmatpush3.bf16.msra.mxu0 %v674_v5  ;;  %s803_s6 = sshll.u32 %s904_s5, 4  ;;  %s804_s6 = int_to_ptr.vmem [resolvable:$false] %s803_s6 }
  0x47   : > { %684 = vmatpush3.bf16.msra.mxu1 %v677_v8  ;;  %663 = vmatprep.mubr.msk.f32.mxu0 %vm901_vm0, %v902_v1  ;;  %p801_p12 = pnand %p800_p8, %p1150_p9  ;;  %s805_s29 = scalar_lea.vmem %s804_s6, 1024 }
  0x48   : > { %670 = vmatprep.mubr.msk.f32.mxu1 %vm901_vm0, %v902_v1  ;;  %p806_p7 = scmp.lt.s32.totalorder %s1078_s7, %s804_s6  ;;  %p807_p13 = scmp.lt.s32.totalorder %s805_s29, %s799_s13 }
  0x49   : > { %p802_p0 = pneg %p801_p12 }
  0x4a   : > { %p808_p4 = por %p807_p13, %p806_p7 }
  0x4c   : > { %p809_p6 = pnand %p808_p4, %p802_p0 }
  0xb3   : > { %v346_v9 = vpop.permute.xlu0 %345 }
  0xb4   : > { %664 = vmatmul.mubr.msk.f32.vlgmr.msra.gmra.mrb[2].mxu0 %vm192_vm1, %v346_v9  ;;  %671 = vmatmul.mubr.msk.f32.vlgmr.msra.gmra.mrb[2].mxu1 %vm192_vm1, %v346_v9 }
 0x118   : > { %v262_v10 = vpop.f32.mrb[0].mxu0 }
 0x119   : > { %267 = vst.msk [vmem:[%s188_s18] sm:$0xff] %vm266_vm2, %v262_v10  ;;  %v337_v11 = vpop.f32.mrb[0].mxu1  ;;  %v651_v12 = vpop.f32.mrb[1].mxu0 }
 0x11a   : > { %620 = vst.msk [vmem:[%s188_s18 + $0x8] sm:$0xff] %vm266_vm2, %v337_v11  ;;  %v658_v13 = vpop.f32.mrb[1].mxu1 }
 0x187   : > { %v415_v14 = vpop.f32.mrb[2].mxu0  ;;  %v489_v15 = vpop.f32.mrb[2].mxu1 }
 0x188   : > { %622 = vst.msk [vmem:[%s188_s18 + $0x10] sm:$0xff] %vm266_vm2, %v415_v14  ;;  %626 = vst.msk [vmem:[%s188_s18 + $0x18] sm:$0xff] %vm266_vm2, %v489_v15  ;;  %v665_v16 = vpop.f32.mrb[3].mxu0  ;;  %v672_v17 = vpop.f32.mrb[3].mxu1 }
 0x189   : > { %812 = shalt.err (!%p809_p6)
}
 0x18a   : > { %s813_s8 = scalar_lea.hbm %s1083_s24, 512  ;;  %s817_s23 = scalar_lea.hbm %s1141_s2, 4096 }
 0x18b   : > { %p814_p3 = scmp.ne.s32.totalorder %s1083_s24, %s813_s8  ;;  %p818_p1 = scmp.lt.u32.totalorder %s1083_s24, %s1141_s2 }
 0x18c   : > { %p819_p2 = scmp.lt.u32.totalorder %s817_s23, %s813_s8  ;;  %p821_p8 = scmp.lt.u32.totalorder %s813_s8, %s1083_s24 }
 0x18d   : > { %p815_p10 = pnand %p814_p3, %p1150_p9 }
 0x18e   : > { %p820_p5 = por %p819_p2, %p818_p1 }
 0x18f   : > { %p816_p11 = pneg %p815_p10 }
 0x190   : > { %p822_p12 = por %p821_p8, %p820_p5 }
 0x192   : > { %p823_p0 = pnand %p822_p12, %p816_p11 }
 0x194   : > { %826 = shalt.err (!%p823_p0)
}
 0x195   : > { %s905_s22 = smov 128   ;;  %s906_s21 = smov 8  }
 0x196   : > { %687 = dma.vmem_to_hbm [thread:$0]  (%p1150_p9), %s1078_s7, 512, %s1083_s24, %s496_s12, %s905_s22, %s905_s22, %s906_s21  }
 0x197 PF: > { %p698_p7 = scmp.ge.s32.totalorder %s897_s16, 2  ;;  %s527_s26 = sand.u32 1, %s869_s9  }
 0x198   : > { %p1151_p13 = scmp.ne.s32.totalorder %s1146_s28, 0  ;;  %s528_s13 = scalar_lea.sflag [#allocation4], %s527_s26 }
 0x19a   : > { %p694_p4 = pnand %p698_p7, %p1151_p13 }
 0x19c   : > { %864 = dma.done.wait (!%p694_p4), %s528_s13, 512  }
 0x19d   : > { %866 = vsyncadd (!%p694_p4), %s528_s13, 4294966784  ;;  %s18_s16 = sadd.s32 1, %s897_s16   ;;  %s1152_s9 = smov %s873_s10 }
 0x19e   : > { %p15_p6 = scmp.ge.s32.totalorder %s18_s16, 10   ;;  %s1153_s10 = smov %s877_s11 }
 0x19f   : > { %s1154_s11 = smov %s1000_s30  ;;  %s1155_s12 = smov %s889_s14 }
 0x1a0   : > { %s1156_s13 = smov %s893_s15  ;;  %s1157_s14 = smov %s1160_s19 }
 0x1a1   : > { %s1158_s15 = smov %s1164_s20  ;;  %17 = sbr.rel (!%p15_p6) target bundleno = 7 (0x7), region = 77 }
 0x1a8   :  { %533 = vsyncpa [#allocation3], 1 }
 0x1a9   :  { %535 = vsyncpa [#allocation3 + $0x1], 1 }
 0x1aa   :  { %536 = vsyncpa [#allocation4], 1 }
 0x1ab   :  { %538 = vsyncpa [#allocation4 + $0x1], 1 }

</bundles_post_ra>
